<compile_context>
chip_gen: v5e
topology: v5e:2x2
jax: 0.10.0
libtpu: 0.0.40
codegen_flags: <defaults>
</compile_context>

<pallas_src>
import jax
import jax.numpy as jnp
from jax.experimental import pallas as pl
from jax.experimental.pallas import tpu as pltpu

_OUT_LANES = 8  # lane 0 = mean head, lane 1 = var head, rest zero


def _predict_kernel(pat_ref, gph_ref,
                    wp_ref, wg_ref, w1pg_ref,
                    bias_ref, wh_ref, bh_ref,
                    out_ref):
    H = w1pg_ref.shape[0]

    pat = pat_ref[...].astype(jnp.float32)     # [TB, Lp*Dp]
    gph = gph_ref[...].astype(jnp.float32)     # [TB, Lg*Dg]

    # One MXU pass per input: columns [:H] = pooled projection, columns [H:]
    # = that projection already pushed through its pred_layer1 slice (all the
    # folding happens at trace time in the wrapper).
    pe = jnp.dot(pat, wp_ref[...], preferred_element_type=jnp.float32)   # [TB, 2H]
    ge = jnp.dot(gph, wg_ref[...], preferred_element_type=jnp.float32)   # [TB, 2H]

    p = pe[:, :H] + bias_ref[0:1, :]           # pooled p_layer output
    g = ge[:, :H] + bias_ref[1:2, :]           # pooled g_layer output

    # pred_layer1(concat([p, g, g-p, g*p])) == p@w1p + g@w1g + (g*p)@w1pg + b1;
    # the p/g terms arrive pre-computed in pe/ge, biases pre-summed in row 2.
    y = (pe[:, H:] + ge[:, H:]
         + jnp.dot(g * p, w1pg_ref[...], preferred_element_type=jnp.float32)
         + bias_ref[2:3, :])
    y = jnp.maximum(y, 0.0)

    # LayerNorm over hidden axis (eps=1e-5); affine folded into the head.
    mu = jnp.mean(y, axis=-1, keepdims=True)
    var = jnp.mean((y - mu) * (y - mu), axis=-1, keepdims=True)
    y = (y - mu) * jax.lax.rsqrt(var + 1e-5)

    # Fused heads: single [TB, 8] store (lane 0 = mean, lane 1 = var).
    out_ref[...] = (jnp.dot(y, wh_ref[...], preferred_element_type=jnp.float32)
                    + bh_ref[...])


def _round_up(x, m):
    return ((x + m - 1) // m) * m


@jax.jit
def base_pool_predict(pattern, graph, params):
    B, Lp, Dp = pattern.shape
    _, Lg, Dg = graph.shape
    H = params["wp"].shape[1]

    # ---- trace-time weight folding (tiny, runs once under jit) ----
    w1 = params["w1"]                                        # [4H, H]
    w1a, w1b, w1c, w1d = w1[0:H], w1[H:2 * H], w1[2 * H:3 * H], w1[3 * H:4 * H]
    w1p = w1a - w1c                                          # multiplies p
    w1g = w1b + w1c                                          # multiplies g
    w1pg = w1d                                               # multiplies g*p

    # mean-pool folded into the projections: x2d @ (tile(w, L)/L) == mean_L(x) @ w
    wp_pool = jnp.tile(params["wp"], (Lp, 1)) / Lp           # [Lp*Dp, H]
    wg_pool = jnp.tile(params["wg"], (Lg, 1)) / Lg           # [Lg*Dg, H]
    wp_ext = jnp.concatenate([wp_pool, wp_pool @ w1p], axis=1)   # [Lp*Dp, 2H]
    wg_ext = jnp.concatenate([wg_pool, wg_pool @ w1g], axis=1)   # [Lg*Dg, 2H]
    b1_eff = params["b1"] + params["bp"] @ w1p + params["bg"] @ w1g
    biases = jnp.concatenate([params["bp"], params["bg"], b1_eff], axis=0)  # [3, H]

    # Fused heads with the LayerNorm affine folded in; padded to 8 lanes.
    wh2 = jnp.concatenate([params["wm"], params["wv"]], axis=1)  # [H, 2]
    bh2 = jnp.concatenate([params["bm"], params["bv"]], axis=1)  # [1, 2]
    whf = params["ln_w"].reshape(H, 1) * wh2
    bhf = bh2 + params["ln_b"] @ wh2
    wh = jnp.zeros((H, _OUT_LANES), jnp.float32).at[:, :2].set(whf)
    bh = jnp.zeros((1, _OUT_LANES), jnp.float32).at[:, :2].set(bhf)

    # Flatten inputs (contiguous reshape, free). bf16 inputs are also fine:
    # the kernel upcasts with astype(float32).
    pat2d = pattern.reshape(B, Lp * Dp)
    gph2d = graph.reshape(B, Lg * Dg)

    # ---- batch tiling: big tiles to amortize per-step overhead, but keep
    # >= 2 grid steps when B allows so both v7x TensorCores get work ----
    if B <= 8:
        TILE_B = B
    else:
        TILE_B = min(1024, _round_up(pl.cdiv(B, 2), 8))
    grid = (pl.cdiv(B, TILE_B),)

    def _resident(arr):  # weights/biases: same block every step -> stay in VMEM
        return pl.BlockSpec(arr.shape, lambda i, _n=arr.ndim: (0,) * _n)

    in_specs = [
        pl.BlockSpec((TILE_B, Lp * Dp), lambda i: (i, 0)),
        pl.BlockSpec((TILE_B, Lg * Dg), lambda i: (i, 0)),
        _resident(wp_ext), _resident(wg_ext), _resident(w1pg),
        _resident(biases), _resident(wh), _resident(bh),
    ]
    out_spec = pl.BlockSpec((TILE_B, _OUT_LANES), lambda i: (i, 0))

    out = pl.pallas_call(
        _predict_kernel,
        out_shape=jax.ShapeDtypeStruct((B, _OUT_LANES), jnp.float32),
        grid=grid,
        in_specs=in_specs,
        out_specs=out_spec,
        compiler_params=pltpu.CompilerParams(
            dimension_semantics=("parallel",)),
    )(pat2d, gph2d, wp_ext, wg_ext, w1pg, biases, wh, bh)

    return out[:, 0:1], out[:, 1:2]


def init_params(key, pattern_dim, graph_dim, hidden_dim):
    """Deterministic init matching the PyTorch module's __init__ scheme."""
    ks = jax.random.split(key, 6)
    std = 1.0 / (hidden_dim ** 0.5)
    # weights stored transposed: [in, out]
    wp = std * jax.random.normal(ks[0], (pattern_dim, hidden_dim), jnp.float32)
    wg = std * jax.random.normal(ks[1], (graph_dim, hidden_dim), jnp.float32)
    w1 = std * jax.random.normal(ks[2], (hidden_dim * 4, hidden_dim), jnp.float32)
    # kaiming_uniform (relu) bound = sqrt(6 / fan_in)
    bound = (6.0 / hidden_dim) ** 0.5
    wm = jax.random.uniform(ks[3], (hidden_dim, 1), jnp.float32, -bound, bound)
    wv = jax.random.uniform(ks[4], (hidden_dim, 1), jnp.float32, -bound, bound)
    return {
        "wp": wp, "bp": jnp.zeros((1, hidden_dim), jnp.float32),
        "wg": wg, "bg": jnp.zeros((1, hidden_dim), jnp.float32),
        "w1": w1, "b1": jnp.zeros((1, hidden_dim), jnp.float32),
        "ln_w": jnp.ones((1, hidden_dim), jnp.float32),
        "ln_b": jnp.zeros((1, hidden_dim), jnp.float32),
        "wm": wm, "bm": jnp.zeros((1, 1), jnp.float32),
        "wv": wv, "bv": jnp.zeros((1, 1), jnp.float32),
    }


def reference_forward(pattern, graph, params):
    """Pure-JAX reference (original un-folded formulation) for checking."""
    p = pattern @ params["wp"] + params["bp"]
    g = graph @ params["wg"] + params["bg"]
    p = jnp.mean(p, axis=1)
    g = jnp.mean(g, axis=1)
    feat = jnp.concatenate([p, g, g - p, g * p], axis=-1)
    y = jnp.maximum(feat @ params["w1"] + params["b1"], 0.0)
    mu = jnp.mean(y, axis=-1, keepdims=True)
    var = jnp.mean((y - mu) ** 2, axis=-1, keepdims=True)
    y = (y - mu) / jnp.sqrt(var + 1e-5) * params["ln_w"] + params["ln_b"]
    return y @ params["wm"] + params["bm"], y @ params["wv"] + params["bv"]


if __name__ == "__main__":
    B, Lp, Lg = 2, 8, 8
    pattern_dim, graph_dim, hidden_dim = 4, 4, 32

    key = jax.random.PRNGKey(0)
    k_pat, k_gph, k_par = jax.random.split(key, 3)
    pattern = jax.random.normal(k_pat, (B, Lp, pattern_dim), jnp.float32)
    graph = jax.random.normal(k_gph, (B, Lg, graph_dim), jnp.float32)
    params = init_params(k_par, pattern_dim, graph_dim, hidden_dim)

    mean_out, var_out = base_pool_predict(pattern, graph, params)
    jax.block_until_ready(mean_out)
    jax.block_until_ready(var_out)

    ref_mean, ref_var = reference_forward(pattern, graph, params)
    assert mean_out.shape == (B, 1) and var_out.shape == (B, 1)
    assert jnp.allclose(mean_out, ref_mean, atol=1e-4, rtol=1e-4)
    assert jnp.allclose(var_out, ref_var, atol=1e-4, rtol=1e-4)

    print("KERNEL_OK")
</pallas_src>

<mosaic_0001>
module attributes {stable_mosaic.version = 11 : i64} {
  func.func @_predict_kernel(%arg0: i32, %arg1: memref<2x32xf32, #tpu.memory_space<vmem>>, %arg2: memref<2x32xf32, #tpu.memory_space<vmem>>, %arg3: memref<32x64xf32, #tpu.memory_space<vmem>>, %arg4: memref<32x64xf32, #tpu.memory_space<vmem>>, %arg5: memref<32x32xf32, #tpu.memory_space<vmem>>, %arg6: memref<3x32xf32, #tpu.memory_space<vmem>>, %arg7: memref<32x8xf32, #tpu.memory_space<vmem>>, %arg8: memref<1x8xf32, #tpu.memory_space<vmem>>, %arg9: memref<2x8xf32, #tpu.memory_space<vmem>>) attributes {dimension_semantics = [#tpu.dimension_semantics<parallel>], iteration_bounds = array<i64: 1>, scalar_prefetch = 0 : i64, scratch_operands = 0 : i64, tpu.core_type = #tpu.core_type<tc>, window_params = [{transform_indices = @transform_0, window_bounds = array<i64: 2, 32>}, {transform_indices = @transform_1, window_bounds = array<i64: 2, 32>}, {pipeline_mode = #tpu.pipeline_mode<synchronous>, transform_indices = @transform_2, window_bounds = array<i64: 32, 64>}, {pipeline_mode = #tpu.pipeline_mode<synchronous>, transform_indices = @transform_3, window_bounds = array<i64: 32, 64>}, {pipeline_mode = #tpu.pipeline_mode<synchronous>, transform_indices = @transform_4, window_bounds = array<i64: 32, 32>}, {pipeline_mode = #tpu.pipeline_mode<synchronous>, transform_indices = @transform_5, window_bounds = array<i64: 3, 32>}, {pipeline_mode = #tpu.pipeline_mode<synchronous>, transform_indices = @transform_6, window_bounds = array<i64: 32, 8>}, {pipeline_mode = #tpu.pipeline_mode<synchronous>, transform_indices = @transform_7, window_bounds = array<i64: 1, 8>}, {transform_indices = @transform_8, window_bounds = array<i64: 2, 8>}]} {
    %c0 = arith.constant 0 : index
    %c0_0 = arith.constant 0 : index
    %0 = vector.load %arg1[%c0, %c0_0] : memref<2x32xf32, #tpu.memory_space<vmem>>, vector<2x32xf32>
    %c0_1 = arith.constant 0 : index
    %c0_2 = arith.constant 0 : index
    %1 = vector.load %arg2[%c0_1, %c0_2] : memref<2x32xf32, #tpu.memory_space<vmem>>, vector<2x32xf32>
    %c0_3 = arith.constant 0 : index
    %c0_4 = arith.constant 0 : index
    %2 = vector.load %arg3[%c0_3, %c0_4] : memref<32x64xf32, #tpu.memory_space<vmem>>, vector<32x64xf32>
    %cst = arith.constant dense<0.000000e+00> : vector<2x64xf32>
    %3 = tpu.matmul %0, %2, %cst {dimension_numbers = #tpu.dot_dimension_numbers<[1], [0], [0], [1], [0, 0, 1, 1], [], []>} : vector<2x32xf32>, vector<32x64xf32>, vector<2x64xf32> -> vector<2x64xf32>
    %c0_5 = arith.constant 0 : index
    %c0_6 = arith.constant 0 : index
    %4 = vector.load %arg4[%c0_5, %c0_6] : memref<32x64xf32, #tpu.memory_space<vmem>>, vector<32x64xf32>
    %cst_7 = arith.constant dense<0.000000e+00> : vector<2x64xf32>
    %5 = tpu.matmul %1, %4, %cst_7 {dimension_numbers = #tpu.dot_dimension_numbers<[1], [0], [0], [1], [0, 0, 1, 1], [], []>} : vector<2x32xf32>, vector<32x64xf32>, vector<2x64xf32> -> vector<2x64xf32>
    %6 = vector.extract_strided_slice %3 {offsets = [0, 0], sizes = [2, 32], strides = [1, 1]} : vector<2x64xf32> to vector<2x32xf32>
    %c0_8 = arith.constant 0 : index
    %c0_9 = arith.constant 0 : index
    %7 = vector.load %arg6[%c0_8, %c0_9] : memref<3x32xf32, #tpu.memory_space<vmem>>, vector<1x32xf32>
    %8 = vector.broadcast %7 : vector<1x32xf32> to vector<2x32xf32>
    %9 = arith.addf %6, %8 : vector<2x32xf32>
    %10 = vector.extract_strided_slice %5 {offsets = [0, 0], sizes = [2, 32], strides = [1, 1]} : vector<2x64xf32> to vector<2x32xf32>
    %c1 = arith.constant 1 : index
    %c0_10 = arith.constant 0 : index
    %11 = vector.load %arg6[%c1, %c0_10] : memref<3x32xf32, #tpu.memory_space<vmem>>, vector<1x32xf32>
    %12 = vector.broadcast %11 : vector<1x32xf32> to vector<2x32xf32>
    %13 = arith.addf %10, %12 : vector<2x32xf32>
    %14 = vector.extract_strided_slice %3 {offsets = [0, 32], sizes = [2, 32], strides = [1, 1]} : vector<2x64xf32> to vector<2x32xf32>
    %15 = vector.extract_strided_slice %5 {offsets = [0, 32], sizes = [2, 32], strides = [1, 1]} : vector<2x64xf32> to vector<2x32xf32>
    %16 = arith.addf %14, %15 : vector<2x32xf32>
    %17 = arith.mulf %13, %9 : vector<2x32xf32>
    %c0_11 = arith.constant 0 : index
    %c0_12 = arith.constant 0 : index
    %18 = vector.load %arg5[%c0_11, %c0_12] : memref<32x32xf32, #tpu.memory_space<vmem>>, vector<32x32xf32>
    %cst_13 = arith.constant dense<0.000000e+00> : vector<2x32xf32>
    %19 = tpu.matmul %17, %18, %cst_13 {dimension_numbers = #tpu.dot_dimension_numbers<[1], [0], [0], [1], [0, 0, 1, 1], [], []>} : vector<2x32xf32>, vector<32x32xf32>, vector<2x32xf32> -> vector<2x32xf32>
    %20 = arith.addf %16, %19 : vector<2x32xf32>
    %c2 = arith.constant 2 : index
    %c0_14 = arith.constant 0 : index
    %21 = vector.load %arg6[%c2, %c0_14] : memref<3x32xf32, #tpu.memory_space<vmem>>, vector<1x32xf32>
    %22 = vector.broadcast %21 : vector<1x32xf32> to vector<2x32xf32>
    %23 = arith.addf %20, %22 : vector<2x32xf32>
    %cst_15 = arith.constant 0.000000e+00 : f32
    %24 = vector.broadcast %cst_15 : f32 to vector<2x32xf32>
    %25 = arith.maximumf %23, %24 : vector<2x32xf32>
    %cst_16 = arith.constant dense<0.000000e+00> : vector<2xf32>
    %26 = vector.multi_reduction <add>, %25, %cst_16 [1] : vector<2x32xf32> to vector<2xf32>
    %27 = vector.shape_cast %26 : vector<2xf32> to vector<2x1xf32>
    %cst_17 = arith.constant 3.200000e+01 : f32
    %28 = vector.broadcast %cst_17 : f32 to vector<2x1xf32>
    %29 = arith.divf %27, %28 : vector<2x1xf32>
    %30 = vector.broadcast %29 : vector<2x1xf32> to vector<2x32xf32>
    %31 = arith.subf %25, %30 : vector<2x32xf32>
    %32 = vector.broadcast %29 : vector<2x1xf32> to vector<2x32xf32>
    %33 = arith.subf %25, %32 : vector<2x32xf32>
    %34 = arith.mulf %31, %33 : vector<2x32xf32>
    %cst_18 = arith.constant dense<0.000000e+00> : vector<2xf32>
    %35 = vector.multi_reduction <add>, %34, %cst_18 [1] : vector<2x32xf32> to vector<2xf32>
    %36 = vector.shape_cast %35 : vector<2xf32> to vector<2x1xf32>
    %cst_19 = arith.constant 3.200000e+01 : f32
    %37 = vector.broadcast %cst_19 : f32 to vector<2x1xf32>
    %38 = arith.divf %36, %37 : vector<2x1xf32>
    %39 = vector.broadcast %29 : vector<2x1xf32> to vector<2x32xf32>
    %40 = arith.subf %25, %39 : vector<2x32xf32>
    %cst_20 = arith.constant 9.99999974E-6 : f32
    %41 = vector.broadcast %cst_20 : f32 to vector<2x1xf32>
    %42 = arith.addf %38, %41 : vector<2x1xf32>
    %43 = math.rsqrt %42 : vector<2x1xf32>
    %44 = vector.broadcast %43 : vector<2x1xf32> to vector<2x32xf32>
    %45 = arith.mulf %40, %44 : vector<2x32xf32>
    %c0_21 = arith.constant 0 : index
    %c0_22 = arith.constant 0 : index
    %46 = vector.load %arg7[%c0_21, %c0_22] : memref<32x8xf32, #tpu.memory_space<vmem>>, vector<32x8xf32>
    %cst_23 = arith.constant dense<0.000000e+00> : vector<2x8xf32>
    %47 = tpu.matmul %45, %46, %cst_23 {dimension_numbers = #tpu.dot_dimension_numbers<[1], [0], [0], [1], [0, 0, 1, 1], [], []>} : vector<2x32xf32>, vector<32x8xf32>, vector<2x8xf32> -> vector<2x8xf32>
    %c0_24 = arith.constant 0 : index
    %c0_25 = arith.constant 0 : index
    %48 = vector.load %arg8[%c0_24, %c0_25] : memref<1x8xf32, #tpu.memory_space<vmem>>, vector<1x8xf32>
    %49 = vector.broadcast %48 : vector<1x8xf32> to vector<2x8xf32>
    %50 = arith.addf %47, %49 : vector<2x8xf32>
    %c0_26 = arith.constant 0 : index
    %c0_27 = arith.constant 0 : index
    %51 = vector.load %arg9[%c0_26, %c0_27] : memref<2x8xf32, #tpu.memory_space<vmem>>, vector<2x8xf32>
    tpu.vector_store %arg9[%c0_26, %c0_27], %50 {strides = array<i32>} : memref<2x8xf32, #tpu.memory_space<vmem>>, vector<2x8xf32>,
    return
  }
  func.func @transform_0(%arg0: i32) -> (i32, i32) {
    %c0_i32 = arith.constant 0 : i32
    %c0_i32_0 = arith.constant 0 : i32
    return %arg0, %c0_i32 : i32, i32
  }
  func.func @transform_1(%arg0: i32) -> (i32, i32) {
    %c0_i32 = arith.constant 0 : i32
    %c0_i32_0 = arith.constant 0 : i32
    return %arg0, %c0_i32 : i32, i32
  }
  func.func @transform_2(%arg0: i32) -> (i32, i32) {
    %c0_i32 = arith.constant 0 : i32
    %c0_i32_0 = arith.constant 0 : i32
    %c0_i32_1 = arith.constant 0 : i32
    return %c0_i32, %c0_i32_0 : i32, i32
  }
  func.func @transform_3(%arg0: i32) -> (i32, i32) {
    %c0_i32 = arith.constant 0 : i32
    %c0_i32_0 = arith.constant 0 : i32
    %c0_i32_1 = arith.constant 0 : i32
    return %c0_i32, %c0_i32_0 : i32, i32
  }
  func.func @transform_4(%arg0: i32) -> (i32, i32) {
    %c0_i32 = arith.constant 0 : i32
    %c0_i32_0 = arith.constant 0 : i32
    %c0_i32_1 = arith.constant 0 : i32
    return %c0_i32, %c0_i32_0 : i32, i32
  }
  func.func @transform_5(%arg0: i32) -> (i32, i32) {
    %c0_i32 = arith.constant 0 : i32
    %c0_i32_0 = arith.constant 0 : i32
    %c0_i32_1 = arith.constant 0 : i32
    return %c0_i32, %c0_i32_0 : i32, i32
  }
  func.func @transform_6(%arg0: i32) -> (i32, i32) {
    %c0_i32 = arith.constant 0 : i32
    %c0_i32_0 = arith.constant 0 : i32
    %c0_i32_1 = arith.constant 0 : i32
    return %c0_i32, %c0_i32_0 : i32, i32
  }
  func.func @transform_7(%arg0: i32) -> (i32, i32) {
    %c0_i32 = arith.constant 0 : i32
    %c0_i32_0 = arith.constant 0 : i32
    %c0_i32_1 = arith.constant 0 : i32
    return %c0_i32, %c0_i32_0 : i32, i32
  }
  func.func @transform_8(%arg0: i32) -> (i32, i32) {
    %c0_i32 = arith.constant 0 : i32
    %c0_i32_0 = arith.constant 0 : i32
    return %arg0, %c0_i32 : i32, i32
  }
}

</mosaic_0001>

<bundles_post_ra>
// kernel: base_pool_predict.1
= control target key start
LH: loop header
LB: loop body
LE: loop exit
PB: predicated region body
PF: predicated region fallthrough
CT: control target
= control target key end

     0   :  { %vm35_vm0 = vcmask 261120   ;;  %s226_s11 = smov 32   ;;  %s227_s13 = smov 96   ;;  %vm138_vm1 = vcmask 254976   ;;  %v228_v31 = vmov 32.0   ;;  %vm205_vm6 = vcmask 58368   ;;  %s352_s2 = inlined_call_operand.vmem [shape: f32[32,64], index: 2, kind: input, shape index: {}]   ;;  %s353_s3 = inlined_call_operand.vmem [shape: f32[32,64], index: 3, kind: input, shape index: {}]   ;;  %s354_s4 = inlined_call_operand.vmem [shape: f32[32,32], index: 4, kind: input, shape index: {}]   ;;  %s355_s0 = inlined_call_operand.vmem [shape: f32[2,32], index: 0, kind: input, shape index: {}]   ;;  %s356_s1 = inlined_call_operand.vmem [shape: f32[2,32], index: 1, kind: input, shape index: {}]   ;;  %s357_s5 = inlined_call_operand.vmem [shape: f32[3,32], index: 5, kind: input, shape index: {}]   ;;  %s358_s6 = inlined_call_operand.vmem [shape: f32[32,8], index: 6, kind: input, shape index: {}]   ;;  %s359_s7 = inlined_call_operand.vmem [shape: f32[1,8], index: 7, kind: input, shape index: {}]   ;;  %s360_s8 = inlined_call_operand.vmem [shape: f32[2,8], index: 8, kind: output, shape index: {}]  }
   0x1   :  { %v34_v0 = vld [vmem:[%s352_s2 + $0x18] sm:$0xff]  ;;  %v33_v2 = vld [vmem:[%s352_s2 + $0x10] sm:$0xff]  ;;  %v32_v4 = vld [vmem:[%s352_s2 + $0x8] sm:$0xff]  ;;  %222 = vrcp.f32 %v228_v31 }
   0x2   :  { %v62_v1 = vld [vmem:[%s353_s3 + $0x18] sm:$0xff]  ;;  %51 = vmatpush.msra.mxu0 %v34_v0  ;;  %v61_v3 = vld [vmem:[%s353_s3 + $0x10] sm:$0xff]  ;;  %v60_v5 = vld [vmem:[%s353_s3 + $0x8] sm:$0xff] }
   0x3   :  { %78 = vmatpush.msra.mxu1 %v62_v1  ;;  %v31_v6 = vld [vmem:[%s352_s2] sm:$0xff]  ;;  %v97_v7 = vld [vmem:[%s354_s4 + $0x18] sm:$0xff]  ;;  %v96_v11 = vld [vmem:[%s354_s4 + $0x10] sm:$0xff] }
   0x4   :  { %52 = vmatpush.msra.mxu0 %v33_v2  ;;  %v59_v8 = vld [vmem:[%s353_s3] sm:$0xff]  ;;  %113 = vmatpush.msra.mxu2 %v97_v7  ;;  %v95_v12 = vld [vmem:[%s354_s4 + $0x8] sm:$0xff]  ;;  %v175_v44 = vld [vmem:[%s358_s6 + $0x18] sm:$0xff] }
   0x5   :  { %79 = vmatpush.msra.mxu1 %v61_v3  ;;  %v29_v9 = vld [vmem:[%s355_s0] sm:$0x3]  ;;  %v220_v23 = vld [vmem:[%s357_s5 + $0x2] ss:$0 sm:$0xff]  ;;  %v174_v45 = vld [vmem:[%s358_s6 + $0x10] sm:$0xff]  ;;  %197 = vmatpush.msra.mxu3 %v175_v44 }
   0x6   :  { %53 = vmatpush.msra.mxu0 %v32_v4  ;;  %v30_v10 = vld [vmem:[%s356_s1] sm:$0x3]  ;;  %114 = vmatpush.msra.mxu2 %v96_v11  ;;  %v173_v46 = vld [vmem:[%s358_s6 + $0x8] sm:$0xff] }
   0x7   :  { %80 = vmatpush.msra.mxu1 %v60_v5  ;;  %v94_v13 = vld [vmem:[%s354_s4] sm:$0xff]  ;;  %v223_v32 = vpop.eup %222  ;;  %198 = vmatpush.msra.mxu3 %v174_v45 }
   0x8   :  { %54 = vmatpush.msra.mxu0 %v31_v6  ;;  %115 = vmatpush.msra.mxu2 %v95_v12  ;;  %v218_v14 = vld [vmem:[%s357_s5] ss:$0 sm:$0xff]  ;;  %v219_v15 = vld [vmem:[%s357_s5 + $0x1] ss:$0 sm:$0xff]  ;;  %v143_v33 = vmul.f32 32.0, %v223_v32  ;;  %vm147_vm2 = vweird.f32 %v223_v32 }
   0x9   :  { %81 = vmatpush.msra.mxu1 %v59_v8  ;;  %211 = vmatmul.msk.f32.vlgmr.msra.gmra.mxu0 %vm35_vm0, %v29_v9  ;;  %v172_v47 = vld [vmem:[%s358_s6] sm:$0xff] }
   0xa   :  { %212 = vmatmul.msk.f32.vlgmr.msra.gmra.mxu1 %vm35_vm0, %v30_v10  ;;  %116 = vmatpush.msra.mxu2 %v94_v13  ;;  %v144_v34 = vsub.f32 1.0, %v143_v33  ;;  %v221_v60 = vld [vmem:[%s359_s7] ss:$0 sm:$0xff] }
   0xb   :  { %199 = vmatpush.msra.mxu3 %v173_v46 }
   0xc   :  { %v145_v35 = vmul.f32 %v223_v32, %v144_v34 }
   0xd   :  { %200 = vmatpush.msra.mxu3 %v172_v47 }
   0xe   :  { %v146_v36 = vadd.f32 %v223_v32, %v145_v35 }
  0x10   :  { %v148_v37 = vsel %vm147_vm2, %v223_v32, %v146_v36 }
  0x86   :  { %v56_v16 = vpop.f32.mrf.mxu0 }
  0x87   :  { %v83_v17 = vpop.f32.mrf.mxu1  ;;  %v88_v18 = vadd.f32 %v218_v14, %v56_v16 }
  0x88   :  { %v91_v19 = vadd.f32 %v219_v15, %v83_v17  ;;  %v92_v20 = vadd.f32 %v83_v17, %v56_v16 }
  0x8a   :  { %v93_v21 = vmul.f32 %v91_v19, %v88_v18 }
  0x8c   :  { %213 = vmatmul.msk.f32.vlgmr.msra.gmra.mxu2 %vm35_vm0, %v93_v21 }
 0x10f   :  { %v118_v22 = vpop.f32.mrf.mxu2 }
 0x110   :  { %122 = vrot.lane.b32.xlu0 %v118_v22, %s226_s11 }
 0x118   :  { %129 = vrot.lane.b32.xlu0 %v220_v23, %s226_s11 }
 0x182   :  { %v123_v24 = vpop.permute.xlu0 %122 }
 0x183   :  { %v125_v25 = vadd.f32 %v123_v24, %v92_v20 }
 0x18a   :  { %v130_v26 = vpop.permute.xlu0 %129 }
 0x18b   :  { %v132_v27 = vadd.f32 %v130_v26, %v125_v25 }
 0x18d   :  { %v133_v28 = vmax.f32 %v132_v27, 0.0 }
 0x18f   :  { %135 = vrot.lane.b32.xlu1 %v133_v28, %s227_s13 }
 0x201   :  { %v136_v29 = vpop.permute.xlu1 %135 }
 0x202   :  { %v139_v30 = vsel %vm138_vm1, %v136_v29, 0.0 }
 0x203   :  { %140 = vadd.xlane.f32.xlu1 %v139_v30 }
 0x276   :  { %v141_v38 = vpop.xlane.xlu1 %140 }
 0x277   :  { %v149_v39 = vmul.f32 %v148_v37, %v141_v38 }
 0x279   :  { %v150_v40 = vsub.f32 %v133_v28, %v149_v39 }
 0x27b   :  { %v151_v41 = vmul.f32 %v150_v40, %v150_v40 }
 0x27d   :  { %153 = vrot.lane.b32.xlu2 %v151_v41, %s227_s13 }
 0x2d7   :  { %v154_v42 = vpop.permute.xlu2 %153 }
 0x2d8   :  { %v156_v43 = vsel %vm138_vm1, %v154_v42, 0.0 }
 0x2d9   :  { %157 = vadd.xlane.f32.xlu2 %v156_v43 }
 0x34c   :  { %v158_v48 = vpop.xlane.xlu2 %157 }
 0x34d   :  { %v159_v49 = vmul.f32 %v158_v48, %v148_v37 }
 0x34f   :  { %v160_v50 = vadd.f32 1e-05, %v159_v49 }
 0x351   :  { %224 = vrsqrt.f32 %v160_v50  ;;  %vm167_vm4 = vweird.f32 %v160_v50 }
 0x357   :  { %v225_v51 = vpop.eup %224 }
 0x358   :  { %v162_v52 = vmul.f32 %v225_v51, %v160_v50  ;;  %vm168_vm3 = vweird.f32 %v225_v51 }
 0x359   :  { %vm169_vm5 = vmor %vm167_vm4, %vm168_vm3 }
 0x35a   :  { %v163_v53 = vmul.f32 %v225_v51, %v162_v52 }
 0x35c   :  { %v164_v54 = vmul.f32 0.5, %v163_v53 }
 0x35e   :  { %v165_v55 = vsub.f32 1.5, %v164_v54 }
 0x360   :  { %v166_v56 = vmul.f32 %v225_v51, %v165_v55 }
 0x362   :  { %v170_v57 = vsel %vm169_vm5, %v225_v51, %v166_v56 }
 0x363   :  { %v171_v58 = vmul.f32 %v170_v57, %v150_v40 }
 0x365   :  { %181 = vrot.lane.b32.xlu0 %v171_v58, %s227_s13 }
 0x3d7   :  { %v182_v59 = vpop.permute.xlu0 %181 }
 0x3d8   :  { %214 = vmatmul.msk.f32.vlgmr.msra.gmra.mxu3 %vm35_vm0, %v182_v59 }
 0x45b   :  { %v202_v61 = vpop.f32.mrf.mxu3 }
 0x45c   :  { %v203_v62 = vadd.f32 %v221_v60, %v202_v61 }
 0x45e   :  { %206 = vst.msk [vmem:[%s360_s8] sm:$0x3] %vm205_vm6, %v203_v62 }

</bundles_post_ra>
